<compile_context>
chip_gen: v5e
topology: v5e:2x2
jax: 0.10.0
libtpu: 0.0.40
codegen_flags: <defaults>
</compile_context>

<pallas_src>
import math
import functools

import jax
import jax.numpy as jnp
from jax.experimental import pallas as pl
from jax.experimental.pallas import tpu as pltpu


def _round_up(x, m):
    return ((x + m - 1) // m) * m


def _equal_linear_kernel(x_ref, w_ref, b_ref, o_ref, acc_ref, *, scale):
    # x_ref: (tb, tk), w_ref: (tk, tn), b_ref: (1, tn), o_ref: (tb, tn)
    k = pl.program_id(2)

    @pl.when(k == 0)
    def _():
        acc_ref[...] = jnp.zeros_like(acc_ref)

    # MXU matmul, f32 accumulate. Scale is NOT applied to the weight here.
    acc_ref[...] += jnp.dot(
        x_ref[...], w_ref[...], preferred_element_type=jnp.float32
    )

    @pl.when(k == pl.num_programs(2) - 1)
    def _():
        # Equalized-LR scale + bias applied once, in f32, on the small
        # (tb, tn) accumulator tile.
        y = acc_ref[...] * scale + b_ref[...].astype(jnp.float32)
        o_ref[...] = y.astype(o_ref.dtype)


def equal_linear(x, weight_orig, bias, *, block_b=256, block_n=256, block_k=512):
    """x: (B, in_dim), weight_orig: (out_dim, in_dim), bias: (out_dim,)."""
    B, in_dim = x.shape
    out_dim, in_dim_w = weight_orig.shape
    assert in_dim == in_dim_w
    scale = math.sqrt(2.0 / in_dim)  # fan_in = original in_dim

    # ---- tile sizes -------------------------------------------------------
    # Batch tile: full batch if small, else block_b (multiple of 8).
    tb = B if B <= block_b else block_b

    # N tile: multiple of 128 for lane-dense output stores.
    n_pad_min = _round_up(out_dim, 128)
    tn = min(block_n, n_pad_min)
    n_pad = _round_up(out_dim, tn)

    # K tile: either the whole (8-aligned) K, or a 128-multiple chunk.
    if in_dim <= block_k:
        k_pad = _round_up(in_dim, 8)
        tk = k_pad
    else:
        tk = block_k  # multiple of 128
        k_pad = _round_up(in_dim, tk)

    # ---- one-time layout prep in the wrapper ------------------------------
    # Pre-transpose weight to (K, N); zero-pad K/N (zeros do not change the
    # result, padded N columns are sliced off below).
    w_t = jnp.transpose(weight_orig)  # (in_dim, out_dim)
    w_p = jnp.pad(w_t, ((0, k_pad - in_dim), (0, n_pad - out_dim)))
    x_p = jnp.pad(x, ((0, 0), (0, k_pad - in_dim)))
    b_p = jnp.pad(bias, (0, n_pad - out_dim)).reshape(1, n_pad)

    grid = (pl.cdiv(B, tb), n_pad // tn, k_pad // tk)

    kernel = functools.partial(_equal_linear_kernel, scale=scale)

    # Explicit VMEM budget (double-buffered ins/outs + f32 accumulator).
    isz_x = jnp.dtype(x.dtype).itemsize
    isz_w = jnp.dtype(weight_orig.dtype).itemsize
    vmem_bytes = (
        2 * tb * tk * isz_x
        + 2 * tk * tn * isz_w
        + 2 * tn * jnp.dtype(bias.dtype).itemsize
        + 2 * tb * tn * isz_x
        + tb * tn * 4
    )
    vmem_limit = int(min(max(2 * vmem_bytes, 16 << 20), 96 << 20))

    cost = pl.CostEstimate(
        flops=2 * B * in_dim * out_dim,
        transcendentals=0,
        bytes_accessed=int(
            B * in_dim * isz_x
            + out_dim * in_dim * isz_w
            + out_dim * jnp.dtype(bias.dtype).itemsize
            + B * out_dim * isz_x
        ),
    )

    out_padded = pl.pallas_call(
        kernel,
        out_shape=jax.ShapeDtypeStruct((B, n_pad), x.dtype),
        grid_spec=pltpu.PrefetchScalarGridSpec(
            num_scalar_prefetch=0,
            grid=grid,
            in_specs=[
                pl.BlockSpec((tb, tk), lambda i, j, k: (i, k)),  # x tile
                pl.BlockSpec((tk, tn), lambda i, j, k: (k, j)),  # weight tile (K,N)
                pl.BlockSpec((1, tn), lambda i, j, k: (0, j)),   # bias tile
            ],
            out_specs=pl.BlockSpec((tb, tn), lambda i, j, k: (i, j)),
            scratch_shapes=[pltpu.VMEM((tb, tn), jnp.float32)],
        ),
        compiler_params=pltpu.CompilerParams(
            dimension_semantics=("parallel", "parallel", "arbitrary"),
            vmem_limit_bytes=vmem_limit,
        ),
        cost_estimate=cost,
    )(x_p, w_p, b_p)

    return out_padded[:, :out_dim]


if __name__ == "__main__":
    key = jax.random.PRNGKey(0)
    k_x, k_w = jax.random.split(key)

    batch, in_dim, out_dim = 8, 32, 64

    x = jax.random.normal(k_x, (batch, in_dim), dtype=jnp.float32)
    # weight_orig ~ N(0,1) as in linear.weight.data.normal_()
    weight_orig = jax.random.normal(k_w, (out_dim, in_dim), dtype=jnp.float32)
    # bias zeroed as in linear.bias.data.zero_()
    bias = jnp.zeros((out_dim,), dtype=jnp.float32)

    out = equal_linear(x, weight_orig, bias)
    out = jax.block_until_ready(out)

    # reference check in plain JAX
    scale = math.sqrt(2.0 / in_dim)
    ref = x @ (weight_orig * scale).T + bias
    assert out.shape == (batch, out_dim)
    assert jnp.allclose(out, ref, atol=1e-5, rtol=1e-5)

    print("KERNEL_OK")
</pallas_src>

<mosaic_0001>
module attributes {stable_mosaic.version = 11 : i64} {
  func.func @_equal_linear_kernel(%arg0: i32, %arg1: i32, %arg2: i32, %arg3: memref<8x32xf32, #tpu.memory_space<vmem>>, %arg4: memref<32x128xf32, #tpu.memory_space<vmem>>, %arg5: memref<1x128xf32, #tpu.memory_space<vmem>>, %arg6: memref<8x128xf32, #tpu.memory_space<vmem>>, %arg7: memref<8x128xf32, #tpu.memory_space<vmem>>) attributes {dimension_semantics = [#tpu.dimension_semantics<parallel>, #tpu.dimension_semantics<parallel>, #tpu.dimension_semantics<arbitrary>], iteration_bounds = array<i64: 1, 1, 1>, scalar_prefetch = 0 : i64, scratch_operands = 1 : i64, tpu.core_type = #tpu.core_type<tc>, window_params = [{transform_indices = @transform_0, window_bounds = array<i64: 8, 32>}, {transform_indices = @transform_1, window_bounds = array<i64: 32, 128>}, {transform_indices = @transform_2, window_bounds = array<i64: 1, 128>}, {transform_indices = @transform_3, window_bounds = array<i64: 8, 128>}]} {
    %c0_i32 = arith.constant 0 : i32
    %0 = arith.cmpi eq, %arg2, %c0_i32 : i32
    %1 = arith.extui %0 : i1 to i32
    %c0_i32_0 = arith.constant 0 : i32
    %2 = arith.cmpi ne, %1, %c0_i32_0 : i32
    scf.if %2 {
      %cst_10 = arith.constant 0.000000e+00 : f32
      %12 = vector.broadcast %cst_10 : f32 to vector<8x128xf32>
      %c0_11 = arith.constant 0 : index
      %c0_12 = arith.constant 0 : index
      %13 = vector.load %arg7[%c0_11, %c0_12] : memref<8x128xf32, #tpu.memory_space<vmem>>, vector<8x128xf32>
      tpu.vector_store %arg7[%c0_11, %c0_12], %12 {strides = array<i32>} : memref<8x128xf32, #tpu.memory_space<vmem>>, vector<8x128xf32>,
    } else {
    }
    %c0 = arith.constant 0 : index
    %c0_1 = arith.constant 0 : index
    %3 = vector.load %arg7[%c0, %c0_1] : memref<8x128xf32, #tpu.memory_space<vmem>>, vector<8x128xf32>
    %c0_2 = arith.constant 0 : index
    %c0_3 = arith.constant 0 : index
    %4 = vector.load %arg3[%c0_2, %c0_3] : memref<8x32xf32, #tpu.memory_space<vmem>>, vector<8x32xf32>
    %c0_4 = arith.constant 0 : index
    %c0_5 = arith.constant 0 : index
    %5 = vector.load %arg4[%c0_4, %c0_5] : memref<32x128xf32, #tpu.memory_space<vmem>>, vector<32x128xf32>
    %cst = arith.constant dense<0.000000e+00> : vector<8x128xf32>
    %6 = tpu.matmul %4, %5, %cst {dimension_numbers = #tpu.dot_dimension_numbers<[1], [0], [0], [1], [0, 0, 1, 1], [], []>} : vector<8x32xf32>, vector<32x128xf32>, vector<8x128xf32> -> vector<8x128xf32>
    %7 = arith.addf %3, %6 : vector<8x128xf32>
    %c0_6 = arith.constant 0 : index
    %c0_7 = arith.constant 0 : index
    %8 = vector.load %arg7[%c0_6, %c0_7] : memref<8x128xf32, #tpu.memory_space<vmem>>, vector<8x128xf32>
    tpu.vector_store %arg7[%c0_6, %c0_7], %7 {strides = array<i32>} : memref<8x128xf32, #tpu.memory_space<vmem>>, vector<8x128xf32>,
    %c0_i32_8 = arith.constant 0 : i32
    %9 = arith.cmpi eq, %arg2, %c0_i32_8 : i32
    %10 = arith.extui %9 : i1 to i32
    %c0_i32_9 = arith.constant 0 : i32
    %11 = arith.cmpi ne, %10, %c0_i32_9 : i32
    scf.if %11 {
      %c0_10 = arith.constant 0 : index
      %c0_11 = arith.constant 0 : index
      %12 = vector.load %arg7[%c0_10, %c0_11] : memref<8x128xf32, #tpu.memory_space<vmem>>, vector<8x128xf32>
      %cst_12 = arith.constant 2.500000e-01 : f32
      %13 = vector.broadcast %cst_12 : f32 to vector<8x128xf32>
      %14 = arith.mulf %12, %13 : vector<8x128xf32>
      %c0_13 = arith.constant 0 : index
      %c0_14 = arith.constant 0 : index
      %15 = vector.load %arg5[%c0_13, %c0_14] : memref<1x128xf32, #tpu.memory_space<vmem>>, vector<1x128xf32>
      %16 = vector.broadcast %15 : vector<1x128xf32> to vector<8x128xf32>
      %17 = arith.addf %14, %16 : vector<8x128xf32>
      %c0_15 = arith.constant 0 : index
      %c0_16 = arith.constant 0 : index
      %18 = vector.load %arg6[%c0_15, %c0_16] : memref<8x128xf32, #tpu.memory_space<vmem>>, vector<8x128xf32>
      tpu.vector_store %arg6[%c0_15, %c0_16], %17 {strides = array<i32>} : memref<8x128xf32, #tpu.memory_space<vmem>>, vector<8x128xf32>,
    } else {
    }
    return
  }
  func.func @transform_0(%arg0: i32, %arg1: i32, %arg2: i32) -> (i32, i32) {
    %c0_i32 = arith.constant 0 : i32
    return %arg0, %arg2 : i32, i32
  }
  func.func @transform_1(%arg0: i32, %arg1: i32, %arg2: i32) -> (i32, i32) {
    %c0_i32 = arith.constant 0 : i32
    return %arg2, %arg1 : i32, i32
  }
  func.func @transform_2(%arg0: i32, %arg1: i32, %arg2: i32) -> (i32, i32) {
    %c0_i32 = arith.constant 0 : i32
    %c0_i32_0 = arith.constant 0 : i32
    return %c0_i32, %arg1 : i32, i32
  }
  func.func @transform_3(%arg0: i32, %arg1: i32, %arg2: i32) -> (i32, i32) {
    %c0_i32 = arith.constant 0 : i32
    return %arg0, %arg1 : i32, i32
  }
}

</mosaic_0001>

<bundles_post_ra>
// kernel: tpu_custom_call.1
= control target key start
LH: loop header
LB: loop body
LE: loop exit
PB: predicated region body
PF: predicated region fallthrough
CT: control target
= control target key end

     0   :  { %8 = vsyncpa [#allocation4], 0  ;;  %s233_s0 = inlined_call_operand.hbm [shape: f32[8,32], index: 0, kind: input, shape index: {}]   ;;  %s234_s1 = inlined_call_operand.hbm [shape: f32[32,128], index: 1, kind: input, shape index: {}]   ;;  %s235_s2 = inlined_call_operand.vmem [shape: f32[1,128], index: 2, kind: input, shape index: {}]   ;;  %s236_s3 = inlined_call_operand.hbm [shape: f32[8,128], index: 3, kind: output, shape index: {}]  }
   0x1   :  { %9 = vsyncpa [#allocation7], 0 }
   0x2   :  { %10 = vsyncpa [#allocation5], 0  ;;  %s16_s14 = sshll.u32 %s233_s0, 4  ;;  %s196_s15 = smov [#allocation3]   ;;  %s17_s14 = int_to_ptr.hbm [resolvable:$true] %s16_s14 }
   0x3   :  { %s18_s16 = sshll.u32 %s196_s15, 4  ;;  %s26_s19 = sshll.u32 %s234_s1, 4  ;;  %s19_s16 = int_to_ptr.vmem [resolvable:$true] %s18_s16  ;;  %s27_s19 = int_to_ptr.hbm [resolvable:$true] %s26_s19 }
   0x4   :  { %21 = dma.hbm_to_vmem [thread:$0]  %s17_s14, 128, %s19_s16, [#allocation4]  }
   0x5   :  { %s197_s20 = smov [#allocation6]   ;;  %s198_s22 = smov 128  }
   0x6   :  { %s28_s21 = sshll.u32 %s197_s20, 4  ;;  %s199_s23 = smov 8   ;;  %s29_s21 = int_to_ptr.vmem [resolvable:$true] %s28_s21 }
   0x7   :  { %34 = dma.hbm_to_vmem [thread:$0]  %s27_s19, 512, %s29_s21, [#allocation7], %s198_s22, %s198_s22, %s199_s23  }
   0x8   :  { %190 = dma.done.wait [#allocation4], 128  }
   0x9   :  { %191 = vsyncadd [#allocation4], 4294967168 }
   0xa   :  { %192 = dma.done.wait [#allocation7], 512  }
   0xb   :  { %193 = vsyncadd [#allocation7], 4294966784  ;;  %v55_v0 = vld [vmem:[#allocation6 + $0x18] sm:$0xff]  ;;  %v54_v1 = vld [vmem:[#allocation6 + $0x10] sm:$0xff]  ;;  %vm56_vm0 = vcmask 261120   ;;  %s200_s24 = smov [#allocation8]  }
   0xc   :  { %72 = vmatpush.msra.mxu0 %v55_v0  ;;  %v53_v2 = vld [vmem:[#allocation6 + $0x8] sm:$0xff]  ;;  %v52_v3 = vld [vmem:[#allocation6] sm:$0xff]  ;;  %v51_v4 = vld [vmem:[#allocation3] sm:$0xff]  ;;  %s98_s25 = sshll.u32 %s200_s24, 4  ;;  %s100_s28 = sshll.u32 %s236_s3, 4  ;;  %s99_s25 = int_to_ptr.vmem [resolvable:$true] %s98_s25  ;;  %s101_s28 = int_to_ptr.hbm [resolvable:$true] %s100_s28 }
   0xd   :  { %v117_v5 = vld [vmem:[%s235_s2] ss:$0 sm:$0xff] }
   0xe   :  { %73 = vmatpush.msra.mxu0 %v54_v1 }
  0x10   :  { %74 = vmatpush.msra.mxu0 %v53_v2 }
  0x12   :  { %75 = vmatpush.msra.mxu0 %v52_v3 }
  0x13   :  { %111 = vmatmul.msk.f32.vlgmr.msra.gmra.mxu0 %vm56_vm0, %v51_v4 }
  0x90   :  { %v77_v6 = vpop.f32.mrf.mxu0 }
  0x91   :  { %v86_v7 = vmul.f32 0.25, %v77_v6 }
  0x93   :  { %v91_v8 = vadd.f32 %v117_v5, %v86_v7 }
  0x95   :  { %92 = vst [vmem:[#allocation8] sm:$0xff] %v91_v8 }
  0x96   :  { %103 = dma.vmem_to_hbm [thread:$0]  %s99_s25, 128, %s101_s28, [#allocation5]  }
  0x97   :  { %194 = dma.done.wait [#allocation5], 128  }
  0x98   :  { %195 = vsyncadd [#allocation5], 4294967168 }
  0x99   :  { %108 = vsyncpa [#allocation4], 1 }
  0x9a   :  { %109 = vsyncpa [#allocation7], 1 }
  0x9b   :  { %110 = vsyncpa [#allocation5], 1 }

</bundles_post_ra>
